<compile_context>
chip_gen: v7x
topology: tpu7x:2x2x1
jax: 0.10.0
libtpu: 0.0.40
codegen_flags: <defaults>
</compile_context>

<pallas_src>
import math

import jax
import jax.numpy as jnp
from jax.experimental import pallas as pl
from jax.experimental.pallas import tpu as pltpu


def _round_up(x, m):
    return (x + m - 1) // m * m


def _kernel(xt_ref, wca_ref, bca_ref, wcb_ref, bcb_ref, wos_ref, resb_ref,
            out_ref):
    xt = xt_ref[0]                                           # (tile_T, K*C_res) bf16
    # Dilated conv: all K taps fused into the contraction dim; gate halves are
    # produced as two separate full-width accumulators (no lane slicing).
    a = jnp.dot(xt, wca_ref[...], preferred_element_type=jnp.float32) + bca_ref[...]
    b = jnp.dot(xt, wcb_ref[...], preferred_element_type=jnp.float32) + bcb_ref[...]
    # GLU: tanh(a) * sigmoid(b_orig) == 0.5 * tanh(a) * (1 + tanh(b_orig/2)).
    # The 0.5 factors live in wcb/bcb (so b == b_orig/2) and in wos.
    h2 = jnp.tanh(a) * (1.0 + jnp.tanh(b))                   # (tile_T, half) f32
    # Fused conv1x1_out | conv1x1_skip: one matmul, one lane-dense 128-wide
    # store.  resb carries fused bias + sqrt(0.5)-scaled residual (zeros on
    # the skip lanes), so no in-kernel slicing/concat is needed.
    fused = jnp.dot(h2.astype(jnp.bfloat16), wos_ref[...],
                    preferred_element_type=jnp.float32) + resb_ref[0]
    out_ref[0] = fused.astype(out_ref.dtype)


def residual_conv1d_glu(x_bct, params, *, kernel_size, dilation, tile_t=512):
    """x_bct: (B, C_res, T) float32, PyTorch layout.

    Returns ((B, C_res, T), (B, C_skip, T)).
    """
    w_conv, b_conv, w_out, b_out, w_skip, b_skip = params
    B, c_res, T = x_bct.shape
    c_gate = w_conv.shape[0]
    c_skip = w_skip.shape[0]
    half = c_gate // 2
    K = kernel_size
    pad = (K - 1) // 2 * dilation
    s = math.sqrt(0.5)

    tile_T = min(tile_t, _round_up(T, 8))
    T_p = _round_up(T, tile_T)
    n_tt = T_p // tile_T
    c_out = c_res + c_skip

    # ---- wrapper glue (plain JAX): layout, tap gathering, weight folding ----
    x_btc = jnp.transpose(x_bct, (0, 2, 1))                   # (B, T, C_res)
    right = (K - 1) * dilation - pad + (T_p - T)
    xp = jnp.pad(x_btc, ((0, 0), (pad, right), (0, 0)))
    xtaps = jnp.concatenate(
        [xp[:, k * dilation:k * dilation + T_p, :] for k in range(K)],
        axis=-1).astype(jnp.bfloat16)                         # (B, T_p, K*C_res)

    w_flat = jnp.transpose(w_conv, (2, 1, 0)).reshape(K * c_res, c_gate)
    wca = w_flat[:, :half].astype(jnp.bfloat16)
    wcb = (0.5 * w_flat[:, half:]).astype(jnp.bfloat16)
    bca = b_conv[:half].reshape(1, half).astype(jnp.float32)
    bcb = (0.5 * b_conv[half:]).reshape(1, half).astype(jnp.float32)

    # Fused 1x1 weights: "out" columns pre-scaled by 0.5*sqrt(0.5) (GLU 0.5 and
    # the residual-path sqrt(0.5)), "skip" columns by 0.5 (GLU 0.5).
    wo = jnp.transpose(w_out[:, :, 0])                        # (half, C_res)
    ws = jnp.transpose(w_skip[:, :, 0])                       # (half, C_skip)
    wos = jnp.concatenate([0.5 * s * wo, 0.5 * ws], axis=1).astype(jnp.bfloat16)

    # sqrt(0.5)-scaled residual zero-padded onto the skip lanes, with the fused
    # bias folded in -> a single lane-dense f32 add in the kernel.
    bos = jnp.concatenate([s * b_out, b_skip]).astype(jnp.float32)
    res = jnp.pad((s * x_btc).astype(jnp.float32), ((0, 0), (0, T_p - T), (0, 0)))
    resb = jnp.concatenate(
        [res, jnp.zeros((B, T_p, c_skip), jnp.float32)], axis=-1) + bos

    fused = pl.pallas_call(
        _kernel,
        out_shape=jax.ShapeDtypeStruct((B, T_p, c_out), x_bct.dtype),
        grid_spec=pltpu.PrefetchScalarGridSpec(
            num_scalar_prefetch=0,
            grid=(B, n_tt),
            in_specs=[
                pl.BlockSpec((1, tile_T, K * c_res), lambda b, t: (b, t, 0)),
                pl.BlockSpec((K * c_res, half), lambda b, t: (0, 0)),
                pl.BlockSpec((1, half), lambda b, t: (0, 0)),
                pl.BlockSpec((K * c_res, half), lambda b, t: (0, 0)),
                pl.BlockSpec((1, half), lambda b, t: (0, 0)),
                pl.BlockSpec((half, c_out), lambda b, t: (0, 0)),
                pl.BlockSpec((1, tile_T, c_out), lambda b, t: (b, t, 0)),
            ],
            out_specs=pl.BlockSpec((1, tile_T, c_out), lambda b, t: (b, t, 0)),
        ),
        compiler_params=pltpu.CompilerParams(
            dimension_semantics=("parallel", "parallel"),
            vmem_limit_bytes=32 * 1024 * 1024),
    )(xtaps, wca, bca, wcb, bcb, wos, resb)

    out_btc = fused[:, :T, :c_res]
    skip_btc = fused[:, :T, c_res:]
    # NOTE: when stacking residual blocks, keep (B, T, C) throughout and drop
    # these transposes; they are only PyTorch-layout glue at the boundary.
    return (jnp.transpose(out_btc, (0, 2, 1)),
            jnp.transpose(skip_btc, (0, 2, 1)))


def ref_forward(x, params, *, kernel_size, dilation):
    """Pure-JAX f32 reference matching PyTorch semantics (eval mode)."""
    w_conv, b_conv, w_out, b_out, w_skip, b_skip = params
    K = kernel_size
    pad = (K - 1) // 2 * dilation
    half = w_conv.shape[0] // 2
    y = jax.lax.conv_general_dilated(
        x, w_conv, window_strides=(1,), padding=[(pad, pad)],
        rhs_dilation=(dilation,),
        dimension_numbers=("NCH", "OIH", "NCH")) + b_conv[None, :, None]
    a, b = y[:, :half, :], y[:, half:, :]
    h = jnp.tanh(a) * jax.nn.sigmoid(b)
    sk = jnp.einsum("oc,bct->bot", w_skip[:, :, 0], h) + b_skip[None, :, None]
    o = jnp.einsum("oc,bct->bot", w_out[:, :, 0], h) + b_out[None, :, None]
    o = (o + x) * math.sqrt(0.5)
    return o, sk


def init_params(key, residual_channels, gate_channels, kernel_size,
                skip_out_channels):
    """Deterministic PyTorch-style uniform(-1/sqrt(fan_in), +) init."""
    half = gate_channels // 2
    ks = jax.random.split(key, 6)

    def u(k, shape, fan_in):
        bound = 1.0 / math.sqrt(fan_in)
        return jax.random.uniform(k, shape, jnp.float32, -bound, bound)

    w_conv = u(ks[0], (gate_channels, residual_channels, kernel_size),
               residual_channels * kernel_size)
    b_conv = u(ks[1], (gate_channels,), residual_channels * kernel_size)
    w_out = u(ks[2], (residual_channels, half, 1), half)
    b_out = u(ks[3], (residual_channels,), half)
    w_skip = u(ks[4], (skip_out_channels, half, 1), half)
    b_skip = u(ks[5], (skip_out_channels,), half)
    return (w_conv, b_conv, w_out, b_out, w_skip, b_skip)


if __name__ == "__main__":
    B = 2
    residual_channels = 64
    gate_channels = 128
    skip_out_channels = 64
    kernel_size = 3
    dilation = 2
    T = 64

    key = jax.random.PRNGKey(0)
    kx, kp = jax.random.split(key)
    x = jax.random.normal(kx, (B, residual_channels, T), jnp.float32)
    params = init_params(kp, residual_channels, gate_channels, kernel_size,
                         skip_out_channels)

    out, skip = residual_conv1d_glu(x, params, kernel_size=kernel_size,
                                    dilation=dilation)
    out, skip = jax.block_until_ready((out, skip))

    out_ref, skip_ref = ref_forward(x, params, kernel_size=kernel_size,
                                    dilation=dilation)
    assert out.shape == (B, residual_channels, T)
    assert skip.shape == (B, skip_out_channels, T)
    # bf16 matmul operands (f32 accumulation) -> looser tolerance vs f32 ref.
    assert jnp.allclose(out, out_ref, atol=2e-2, rtol=2e-2)
    assert jnp.allclose(skip, skip_ref, atol=2e-2, rtol=2e-2)

    print("KERNEL_OK")
</pallas_src>

<mosaic_0001>
module attributes {stable_mosaic.version = 11 : i64} {
  func.func @_kernel(%arg0: i32, %arg1: i32, %arg2: memref<1x64x192xbf16, #tpu.memory_space<vmem>>, %arg3: memref<192x64xbf16, #tpu.memory_space<vmem>>, %arg4: memref<1x64xf32, #tpu.memory_space<vmem>>, %arg5: memref<192x64xbf16, #tpu.memory_space<vmem>>, %arg6: memref<1x64xf32, #tpu.memory_space<vmem>>, %arg7: memref<64x128xbf16, #tpu.memory_space<vmem>>, %arg8: memref<1x64x128xf32, #tpu.memory_space<vmem>>, %arg9: memref<1x64x128xf32, #tpu.memory_space<vmem>>) attributes {dimension_semantics = [#tpu.dimension_semantics<parallel>, #tpu.dimension_semantics<parallel>], iteration_bounds = array<i64: 2, 1>, scalar_prefetch = 0 : i64, scratch_operands = 0 : i64, tpu.core_type = #tpu.core_type<tc>, window_params = [{transform_indices = @transform_0, window_bounds = array<i64: 1, 64, 192>}, {pipeline_mode = #tpu.pipeline_mode<synchronous>, transform_indices = @transform_1, window_bounds = array<i64: 192, 64>}, {pipeline_mode = #tpu.pipeline_mode<synchronous>, transform_indices = @transform_2, window_bounds = array<i64: 1, 64>}, {pipeline_mode = #tpu.pipeline_mode<synchronous>, transform_indices = @transform_3, window_bounds = array<i64: 192, 64>}, {pipeline_mode = #tpu.pipeline_mode<synchronous>, transform_indices = @transform_4, window_bounds = array<i64: 1, 64>}, {pipeline_mode = #tpu.pipeline_mode<synchronous>, transform_indices = @transform_5, window_bounds = array<i64: 64, 128>}, {transform_indices = @transform_6, window_bounds = array<i64: 1, 64, 128>}, {transform_indices = @transform_7, window_bounds = array<i64: 1, 64, 128>}]} {
    %c0 = arith.constant 0 : index
    %c0_0 = arith.constant 0 : index
    %c0_1 = arith.constant 0 : index
    %0 = vector.load %arg2[%c0, %c0_0, %c0_1] : memref<1x64x192xbf16, #tpu.memory_space<vmem>>, vector<1x64x192xbf16>
    %1 = vector.shape_cast %0 : vector<1x64x192xbf16> to vector<64x192xbf16>
    %c0_2 = arith.constant 0 : index
    %c0_3 = arith.constant 0 : index
    %2 = vector.load %arg3[%c0_2, %c0_3] : memref<192x64xbf16, #tpu.memory_space<vmem>>, vector<192x64xbf16>
    %cst = arith.constant dense<0.000000e+00> : vector<64x64xf32>
    %3 = tpu.matmul %1, %2, %cst {dimension_numbers = #tpu.dot_dimension_numbers<[1], [0], [0], [1], [0, 0, 1, 1], [], []>} : vector<64x192xbf16>, vector<192x64xbf16>, vector<64x64xf32> -> vector<64x64xf32>
    %c0_4 = arith.constant 0 : index
    %c0_5 = arith.constant 0 : index
    %4 = vector.load %arg4[%c0_4, %c0_5] : memref<1x64xf32, #tpu.memory_space<vmem>>, vector<1x64xf32>
    %5 = vector.broadcast %4 : vector<1x64xf32> to vector<64x64xf32>
    %6 = arith.addf %3, %5 : vector<64x64xf32>
    %c0_6 = arith.constant 0 : index
    %c0_7 = arith.constant 0 : index
    %7 = vector.load %arg5[%c0_6, %c0_7] : memref<192x64xbf16, #tpu.memory_space<vmem>>, vector<192x64xbf16>
    %cst_8 = arith.constant dense<0.000000e+00> : vector<64x64xf32>
    %8 = tpu.matmul %1, %7, %cst_8 {dimension_numbers = #tpu.dot_dimension_numbers<[1], [0], [0], [1], [0, 0, 1, 1], [], []>} : vector<64x192xbf16>, vector<192x64xbf16>, vector<64x64xf32> -> vector<64x64xf32>
    %c0_9 = arith.constant 0 : index
    %c0_10 = arith.constant 0 : index
    %9 = vector.load %arg6[%c0_9, %c0_10] : memref<1x64xf32, #tpu.memory_space<vmem>>, vector<1x64xf32>
    %10 = vector.broadcast %9 : vector<1x64xf32> to vector<64x64xf32>
    %11 = arith.addf %8, %10 : vector<64x64xf32>
    %12 = math.tanh %6 : vector<64x64xf32>
    %13 = math.tanh %11 : vector<64x64xf32>
    %cst_11 = arith.constant 1.000000e+00 : f32
    %14 = vector.broadcast %cst_11 : f32 to vector<64x64xf32>
    %15 = arith.addf %14, %13 : vector<64x64xf32>
    %16 = arith.mulf %12, %15 : vector<64x64xf32>
    %17 = arith.truncf %16 : vector<64x64xf32> to vector<64x64xbf16>
    %c0_12 = arith.constant 0 : index
    %c0_13 = arith.constant 0 : index
    %18 = vector.load %arg7[%c0_12, %c0_13] : memref<64x128xbf16, #tpu.memory_space<vmem>>, vector<64x128xbf16>
    %cst_14 = arith.constant dense<0.000000e+00> : vector<64x128xf32>
    %19 = tpu.matmul %17, %18, %cst_14 {dimension_numbers = #tpu.dot_dimension_numbers<[1], [0], [0], [1], [0, 0, 1, 1], [], []>} : vector<64x64xbf16>, vector<64x128xbf16>, vector<64x128xf32> -> vector<64x128xf32>
    %c0_15 = arith.constant 0 : index
    %c0_16 = arith.constant 0 : index
    %c0_17 = arith.constant 0 : index
    %20 = vector.load %arg8[%c0_15, %c0_16, %c0_17] : memref<1x64x128xf32, #tpu.memory_space<vmem>>, vector<1x64x128xf32>
    %21 = vector.shape_cast %20 : vector<1x64x128xf32> to vector<64x128xf32>
    %22 = arith.addf %19, %21 : vector<64x128xf32>
    %c0_18 = arith.constant 0 : index
    %c0_19 = arith.constant 0 : index
    %c0_20 = arith.constant 0 : index
    %23 = vector.load %arg9[%c0_18, %c0_19, %c0_20] : memref<1x64x128xf32, #tpu.memory_space<vmem>>, vector<1x64x128xf32>
    %24 = vector.shape_cast %23 : vector<1x64x128xf32> to vector<64x128xf32>
    %25 = vector.shape_cast %22 : vector<64x128xf32> to vector<1x64x128xf32>
    tpu.vector_store %arg9[%c0_18, %c0_19, %c0_20], %25 {strides = array<i32>} : memref<1x64x128xf32, #tpu.memory_space<vmem>>, vector<1x64x128xf32>,
    return
  }
  func.func @transform_0(%arg0: i32, %arg1: i32) -> (i32, i32, i32) {
    %c0_i32 = arith.constant 0 : i32
    %c0_i32_0 = arith.constant 0 : i32
    return %arg0, %arg1, %c0_i32 : i32, i32, i32
  }
  func.func @transform_1(%arg0: i32, %arg1: i32) -> (i32, i32) {
    %c0_i32 = arith.constant 0 : i32
    %c0_i32_0 = arith.constant 0 : i32
    %c0_i32_1 = arith.constant 0 : i32
    return %c0_i32, %c0_i32_0 : i32, i32
  }
  func.func @transform_2(%arg0: i32, %arg1: i32) -> (i32, i32) {
    %c0_i32 = arith.constant 0 : i32
    %c0_i32_0 = arith.constant 0 : i32
    %c0_i32_1 = arith.constant 0 : i32
    return %c0_i32, %c0_i32_0 : i32, i32
  }
  func.func @transform_3(%arg0: i32, %arg1: i32) -> (i32, i32) {
    %c0_i32 = arith.constant 0 : i32
    %c0_i32_0 = arith.constant 0 : i32
    %c0_i32_1 = arith.constant 0 : i32
    return %c0_i32, %c0_i32_0 : i32, i32
  }
  func.func @transform_4(%arg0: i32, %arg1: i32) -> (i32, i32) {
    %c0_i32 = arith.constant 0 : i32
    %c0_i32_0 = arith.constant 0 : i32
    %c0_i32_1 = arith.constant 0 : i32
    return %c0_i32, %c0_i32_0 : i32, i32
  }
  func.func @transform_5(%arg0: i32, %arg1: i32) -> (i32, i32) {
    %c0_i32 = arith.constant 0 : i32
    %c0_i32_0 = arith.constant 0 : i32
    %c0_i32_1 = arith.constant 0 : i32
    return %c0_i32, %c0_i32_0 : i32, i32
  }
  func.func @transform_6(%arg0: i32, %arg1: i32) -> (i32, i32, i32) {
    %c0_i32 = arith.constant 0 : i32
    %c0_i32_0 = arith.constant 0 : i32
    return %arg0, %arg1, %c0_i32 : i32, i32, i32
  }
  func.func @transform_7(%arg0: i32, %arg1: i32) -> (i32, i32, i32) {
    %c0_i32 = arith.constant 0 : i32
    %c0_i32_0 = arith.constant 0 : i32
    return %arg0, %arg1, %c0_i32 : i32, i32, i32
  }
}

</mosaic_0001>

<bundles_post_ra>
// kernel: tpu_custom_call.1
= control target key start
LH: loop header
LB: loop body
LE: loop exit
PB: predicated region body
PF: predicated region fallthrough
CT: control target
= control target key end

     0   :  { %12 = vsyncpa [#allocation3], 0  ;;  %s1760_s0 = inlined_call_operand.vmem [shape: bf16[2,64,192], index: 0, kind: input, shape index: {}]   ;;  %s1761_s1 = inlined_call_operand.vmem [shape: bf16[192,64], index: 1, kind: input, shape index: {}]   ;;  %s1762_s2 = inlined_call_operand.vmem [shape: f32[1,64], index: 2, kind: input, shape index: {}]   ;;  %s1763_s3 = inlined_call_operand.vmem [shape: bf16[192,64], index: 3, kind: input, shape index: {}]   ;;  %s1764_s4 = inlined_call_operand.vmem [shape: f32[1,64], index: 4, kind: input, shape index: {}]   ;;  %s1765_s5 = inlined_call_operand.hbm [shape: bf16[64,128], index: 5, kind: input, shape index: {}]   ;;  %s1766_s6 = inlined_call_operand.vmem [shape: f32[2,64,128], index: 6, kind: input, shape index: {}]   ;;  %s1767_s7 = inlined_call_operand.hbm [shape: f32[2,64,128], index: 7, kind: output, shape index: {}]  }
   0x1   :  { %13 = vsyncpa [#allocation4], 0 }
   0x2   :  { %15 = vsyncpa [#allocation4 + $0x1], 0  ;;  %s1449_s24 = smov 0   ;;  %s1451_s25 = smov 0  }
   0x3   :  { %s1453_s26 = smov 0   ;;  %s1455_s27 = smov 0  }
   0x4   :  { %s1457_s28 = smov 0   ;;  %s1459_s29 = smov 0  }
   0x5 LB: > { %s1045_s30 = sadd.s32 4294967295, %s1400_s29   ;;  %s1046_s8 = sadd.s32 4294967294, %s1400_s29   ;;  %s1400_s29 = sphi %s1459_s29, %s21_s29   ;;  %s1396_s28 = sphi %s1457_s28, %s1785_s28   ;;  %s1392_s27 = sphi %s1455_s27, %s1784_s27   ;;  %s1388_s26 = sphi %s1453_s26, %s1783_s26   ;;  %s1384_s25 = sphi %s1451_s25, %s1782_s25   ;;  %s1380_s24 = sphi %s1449_s24, %s1781_s24  }
   0x6   : > { %s33_s9 = sadd.s32 1, %s1396_s28  ;;  %s203_s10 = sadd.s32 1, %s1388_s26 }
   0x7   : > { %p35_p0 = scmp.ge.s32.totalorder %s33_s9, 2  ;;  %p213_p1 = scmp.ne.s32.totalorder %s1388_s26, %s1384_s25 }
   0x8   : > { %p214_p2 = scmp.eq.s32.totalorder %s1045_s30, 1  ;;  %p219_p3 = scmp.ne.s32.totalorder %s1384_s25, %s1380_s24 }
   0x9   : > { %s1787_s9 = smov (%p35_p0, %s33_s9), 0  ;;  %p220_p5 = scmp.eq.s32.totalorder %s1046_s8, 1 }
   0xa   : > { %p1489_p4 = por %p214_p2, %p213_p1  ;;  %s198_s12 = ssub.s32 %s1396_s28, %s1787_s9 }
   0xb   : > { %p1047_p6 = scmp.ge.s32.totalorder %s1400_s29, 1  ;;  %p201_p7 = scmp.eq.s32.totalorder %s198_s12, 0 }
   0xc   : > { %s1772_s11 = scalar_select %p1489_p4, 1, 0 }
   0xd   : > { %p1496_p8 = por %p220_p5, %p219_p3  ;;  %p227_p9 = scmp.lt.s32.totalorder %s1400_s29, 3 }
   0xe   : > { %s1502_s14 = scalar_select %p201_p7, %s1388_s26, %s203_s10  }
   0xf   : > { %s1773_s13 = scalar_select %p1496_p8, 1, 0 }
  0x10   : > { %p1504_p10 = pnand %p1047_p6, %p227_p9  ;;  %p1508_p11 = scmp.eq.s32.totalorder %s1045_s30, 0 }
  0x11   : > { %s1402_s17 = smov [#allocation2]   ;;  %s1290_s22 = scalar_lea.hbm %s1765_s5, 512 }
  0x12   : > { %s1774_s15 = scalar_select %p1504_p10, 1, 0 }
  0x13   : > { %s1775_s16 = scalar_select %p1508_p11, 1, 0 }
  0x14   : > { %p1153_p12 = pneg %p1504_p10  ;;  %s251_s18 = sshll.u32 %s1402_s17, 4  ;;  %s252_s18 = int_to_ptr.vmem [resolvable:$true] %s251_s18 }
  0x15   : > { %p1291_p0 = scmp.ne.s32.totalorder %s1765_s5, %s1290_s22  ;;  %p1297_p5 = scmp.lt.u32.totalorder %s1290_s22, %s1765_s5 }
  0x16   : > { %p1516_p13 = pnand %p1508_p11, %p1153_p12 }
  0x18   : > { %p1292_p1 = pneg %p1516_p13 }
  0x1a   : > { %p1293_p2 = pnand %p1292_p1, %p1291_p0 }
  0x1c   : > { %p1294_p3 = pneg %p1293_p2 }
  0x1e   : > { %p1299_p6 = pnand %p1297_p5, %p1294_p3 }
  0x20   : > { %1302 = shalt.err (!%p1299_p6)
}
  0x21   : > { %s1303_s12 = scalar_lea.vmem %s252_s18, 512  ;;  %p1311_p8 = scmp.lt.s32.totalorder %s252_s18, %s252_s18 }
  0x22   : > { %p1304_p7 = scmp.ne.s32.totalorder %s252_s18, %s1303_s12  ;;  %p1312_p4 = scmp.lt.s32.totalorder %s1303_s12, %s1303_s12 }
  0x24   : > { %p1306_p9 = pnand %p1304_p7, %p1292_p1  ;;  %p1313_p11 = por %p1312_p4, %p1311_p8 }
  0x26   : > { %p1307_p12 = pneg %p1306_p9 }
  0x28   : > { %p1314_p10 = pnand %p1313_p11, %p1307_p12 }
  0x2a   : > { %1317 = shalt.err (!%p1314_p10)
}
  0x2b   : > { %s1403_s17 = smov 64   ;;  %s1404_s20 = smov 4  }
  0x2c   : > { %1156 = dma.hbm_to_vmem [thread:$0]  (!%p1516_p13), %s1765_s5, 512, %s252_s18, [#allocation3], %s1403_s17, %s1403_s17, %s1404_s20  }
  0x2d   : > { %p1777_p0 = scmp.ne.s32.totalorder %s1774_s15, 0 }
  0x2e   : > { %p1778_p2 = scmp.ne.s32.totalorder (!%p1777_p0), %s1775_s16, 0 }
  0x2f   : > { %294 = sbr.rel (%p1777_p0) target bundleno = 594 (0x252), region = 48 }
  0x36   : > { %1371 = dma.done.wait (%p1778_p2), [#allocation3], 512  }
  0x37   : > { %1373 = vsyncadd (%p1778_p2), [#allocation3], 4294966784  ;;  %v1405_v0 = vmov 0   ;;  %v1218_v1 = vld [vmem:[%s1761_s1] sm:$0xff]   ;;  %v1220_v3 = vld [vmem:[%s1761_s1 + $0x8] sm:$0xff]   ;;  %p341_p4 = scmp.lt.s32.totalorder %s1392_s27, 1 }
  0x38   : > { %523 = vmatprep.subr.bf16.mxu0 %v1405_v0  ;;  %691 = vmatprep.subr.bf16.mxu1 %v1405_v0  ;;  %v1219_v2 = vld [vmem:[%s1763_s3] sm:$0xff]   ;;  %v1221_v4 = vld [vmem:[%s1763_s3 + $0x8] sm:$0xff]   ;;  %v1222_v5 = vld [vmem:[%s1761_s1 + $0x10] sm:$0xff]   ;;  %vm510_vm0 = vcmask 523264   ;;  %s337_s21 = sand.u32 1, %s1384_s25   ;;  %p1779_p10 = scmp.ne.s32.totalorder %s1772_s11, 0 }
  0x39   : > { %524 = vmatpush1.bf16.msra.mxu0 %v1218_v1  ;;  %692 = vmatpush1.bf16.msra.mxu1 %v1219_v2  ;;  %v1223_v6 = vld [vmem:[%s1763_s3 + $0x10] sm:$0xff]   ;;  %v1224_v7 = vld [vmem:[%s1761_s1 + $0x18] sm:$0xff]   ;;  %v1226_v9 = vld [vmem:[%s1761_s1 + $0x20] sm:$0xff]   ;;  %s1583_s10 = scalar_select %p341_p4, %s1392_s27, 1 }
  0x3a   : > { %525 = vmatprep.subr.bf16.mxu0 %v1405_v0  ;;  %693 = vmatprep.subr.bf16.mxu1 %v1405_v0  ;;  %v1225_v8 = vld [vmem:[%s1763_s3 + $0x18] sm:$0xff]   ;;  %v1227_v10 = vld [vmem:[%s1763_s3 + $0x20] sm:$0xff]   ;;  %v1228_v11 = vld [vmem:[%s1761_s1 + $0x28] sm:$0xff]   ;;  %s1052_s18 = sshll.u32 %s337_s21, 6  ;;  %s1406_s20 = smov [#allocation5]  }
  0x3b   : > { %v1229_v12 = vld [vmem:[%s1763_s3 + $0x28] sm:$0xff]   ;;  %s1112_s23 = sshll.u32 %s1583_s10, 6  ;;  %v1230_v13 = vld [vmem:[%s1761_s1 + $0x30] sm:$0xff]   ;;  %v1232_v16 = vld [vmem:[%s1761_s1 + $0x38] sm:$0xff]   ;;  %s339_s8 = scalar_lea.vmem [#allocation5], %s1052_s18 }
  0x3c   : > { %s1603_s15 = scalar_lea.vmem %s1760_s0, %s1112_s23  ;;  %v1231_v14 = vld [vmem:[%s1763_s3 + $0x30] sm:$0xff]   ;;  %v1233_v17 = vld [vmem:[%s1763_s3 + $0x38] sm:$0xff]   ;;  %v1234_v18 = vld [vmem:[%s1761_s1 + $0x40] sm:$0xff]   ;;  %s359_s30 = scalar_lea.vmem %s1766_s6, %s1112_s23 }
  0x3d   : > { %526 = vmatpush1.bf16.msra.mxu0 %v1220_v3  ;;  %694 = vmatpush1.bf16.msra.mxu1 %v1221_v4  ;;  %v1244_v15 = vld [vmem:[%s1603_s15 + $0x4] ss:$8 sps:$4 sm:$0xff]   ;;  %v1238_v22 = vld [vmem:[%s1761_s1 + $0x50] sm:$0xff]   ;;  %v1240_v24 = vld [vmem:[%s1761_s1 + $0x58] sm:$0xff]   ;;  %s933_s10 = sshll.u32 %s339_s8, 4  ;;  %s1114_s23 = sshll.u32 %s1392_s27, 10  ;;  %s1705_s10 = int_to_ptr.vmem [resolvable:$true] %s933_s10 }
  0x3e   : > { %527 = vmatprep.subr.bf16.mxu0 %v1405_v0  ;;  %695 = vmatprep.subr.bf16.mxu1 %v1405_v0  ;;  %v1235_v19 = vld [vmem:[%s1763_s3 + $0x40] sm:$0xff]   ;;  %v1236_v20 = vld [vmem:[%s1761_s1 + $0x48] sm:$0xff]   ;;  %v1239_v23 = vld [vmem:[%s1763_s3 + $0x50] sm:$0xff]   ;;  %s1710_s12 = scalar_lea.hbm %s1767_s7, %s1114_s23  ;;  %s1714_s27 = scalar_lea.sflag [#allocation4], %s337_s21 }
  0x3f   : > { %1078 = vmatprep.mubr.msk.bf16.mxu0 %vm510_vm0, %v1244_v15  ;;  %1095 = vmatprep.mubr.msk.bf16.mxu1 %vm510_vm0, %v1244_v15  ;;  %v1237_v21 = vld [vmem:[%s1763_s3 + $0x48] sm:$0xff]   ;;  %v1241_v25 = vld [vmem:[%s1763_s3 + $0x58] sm:$0xff]   ;;  %v1254_v33 = vld [vmem:[#allocation2] sm:$0xff]   ;;  %s1318_s17 = scalar_lea.vmem %s1705_s10, 1024  ;;  %s1322_s22 = sshll.u32 %s1406_s20, 4  ;;  %s1323_s22 = int_to_ptr.vmem [resolvable:$false] %s1322_s22 }
  0x40   : > { %v1242_v26 = vld [vmem:[%s1603_s15] ss:$8 sps:$4 sm:$0xff]   ;;  %v1245_v27 = vld [vmem:[%s1603_s15 + $0x14] ss:$8 sps:$4 sm:$0xff]   ;;  %v1247_v28 = vld [vmem:[%s1603_s15 + $0x10] ss:$8 sps:$4 sm:$0xff]   ;;  %p1319_p8 = scmp.ne.s32.totalorder %s1705_s10, %s1318_s17  ;;  %p1325_p1 = scmp.lt.s32.totalorder %s1705_s10, %s1323_s22 }
  0x41   : > { %528 = vmatpush1.bf16.msra.mxu0 %v1222_v5  ;;  %696 = vmatpush1.bf16.msra.mxu1 %v1223_v6  ;;  %v1248_v29 = vld [vmem:[%s1603_s15 + $0x24] ss:$8 sps:$4 sm:$0xff]   ;;  %v1250_v30 = vld [vmem:[%s1603_s15 + $0x20] ss:$8 sps:$4 sm:$0xff]   ;;  %v1251_v31 = vld [vmem:[%s1603_s15 + $0x34] ss:$8 sps:$4 sm:$0xff]  }
  0x42   : > { %529 = vmatprep.subr.bf16.mxu0 %v1405_v0  ;;  %697 = vmatprep.subr.bf16.mxu1 %v1405_v0  ;;  %v1253_v32 = vld [vmem:[%s1603_s15 + $0x30] ss:$8 sps:$4 sm:$0xff]   ;;  %v1255_v34 = vld [vmem:[#allocation2 + $0x8] sm:$0xff]   ;;  %v1669_v37 = vld [vmem:[%s1762_s2] ss:$0 sm:$0xff]  ;;  %p1320_p11 = pnand %p1319_p8, %p1779_p10  ;;  %s1324_s19 = scalar_lea.vmem %s1323_s22, 2048 }
  0x43   : > { %v1256_v35 = vld [vmem:[#allocation2 + $0x10] sm:$0xff]   ;;  %v1257_v36 = vld [vmem:[#allocation2 + $0x18] sm:$0xff]   ;;  %v1674_v38 = vld [vmem:[%s1764_s4] ss:$0 sm:$0xff]  ;;  %p1326_p3 = scmp.lt.s32.totalorder %s1324_s19, %s1318_s17 }
  0x44   : > { %p1321_p13 = pneg %p1320_p11 }
  0x45   : > { %530 = vmatpush1.bf16.msra.mxu0 %v1224_v7  ;;  %698 = vmatpush1.bf16.msra.mxu1 %v1225_v8  ;;  %p1327_p5 = por %p1326_p3, %p1325_p1 }
  0x46   : > { %531 = vmatprep.subr.bf16.mxu0 %v1405_v0  ;;  %699 = vmatprep.subr.bf16.mxu1 %v1405_v0 }
  0x47   : > { %p1328_p6 = pnand %p1327_p5, %p1321_p13 }
  0x49   : > { %532 = vmatpush1.bf16.msra.mxu0 %v1226_v9  ;;  %700 = vmatpush1.bf16.msra.mxu1 %v1227_v10 }
  0x4a   : > { %533 = vmatprep.subr.bf16.mxu0 %v1405_v0  ;;  %701 = vmatprep.subr.bf16.mxu1 %v1405_v0 }
  0x4d   : > { %534 = vmatpush1.bf16.msra.mxu0 %v1228_v11  ;;  %702 = vmatpush1.bf16.msra.mxu1 %v1229_v12 }
  0x4e   : > { %535 = vmatprep.subr.bf16.mxu0 %v1405_v0  ;;  %703 = vmatprep.subr.bf16.mxu1 %v1405_v0 }
  0x51   : > { %536 = vmatpush1.bf16.msra.mxu0 %v1230_v13  ;;  %704 = vmatpush1.bf16.msra.mxu1 %v1231_v14 }
  0x52   : > { %537 = vmatprep.subr.bf16.mxu0 %v1405_v0  ;;  %705 = vmatprep.subr.bf16.mxu1 %v1405_v0 }
  0x55   : > { %538 = vmatpush1.bf16.msra.mxu0 %v1232_v16  ;;  %706 = vmatpush1.bf16.msra.mxu1 %v1233_v17 }
  0x56   : > { %539 = vmatprep.subr.bf16.mxu0 %v1405_v0  ;;  %707 = vmatprep.subr.bf16.mxu1 %v1405_v0 }
  0x59   : > { %540 = vmatpush1.bf16.msra.mxu0 %v1234_v18  ;;  %708 = vmatpush1.bf16.msra.mxu1 %v1235_v19 }
  0x5a   : > { %541 = vmatprep.subr.bf16.mxu0 %v1405_v0  ;;  %709 = vmatprep.subr.bf16.mxu1 %v1405_v0 }
  0x5d   : > { %542 = vmatpush1.bf16.msra.mxu0 %v1236_v20  ;;  %710 = vmatpush1.bf16.msra.mxu1 %v1237_v21 }
  0x5e   : > { %543 = vmatprep.subr.bf16.mxu0 %v1405_v0  ;;  %711 = vmatprep.subr.bf16.mxu1 %v1405_v0 }
  0x61   : > { %544 = vmatpush1.bf16.msra.mxu0 %v1238_v22  ;;  %712 = vmatpush1.bf16.msra.mxu1 %v1239_v23 }
  0x62   : > { %545 = vmatprep.subr.bf16.mxu0 %v1405_v0  ;;  %713 = vmatprep.subr.bf16.mxu1 %v1405_v0 }
  0x65   : > { %546 = vmatpush1.bf16.msra.mxu0 %v1240_v24  ;;  %714 = vmatpush1.bf16.msra.mxu1 %v1241_v25 }
  0x66   : > { %1123 = vmatprep.subr.bf16.mxu0 %v1254_v33  ;;  %1139 = vmatprep.subr.bf16.mxu1 %v1254_v33 }
  0x68   : > { %556 = vmatmul.mubr.bf16.vlgmr.msra.gmra.mrb[0].mxu0 %v1242_v26  ;;  %724 = vmatmul.mubr.bf16.vlgmr.msra.gmra.mrb[0].mxu1 %v1242_v26 }
  0x69   : > { %1079 = vmatprep.mubr.msk.bf16.mxu0 %vm510_vm0, %v1245_v27  ;;  %1096 = vmatprep.mubr.msk.bf16.mxu1 %vm510_vm0, %v1245_v27 }
  0x6a   : > { %1124 = vmatpush3.bf16.msra.mxu0 %v1254_v33  ;;  %1143 = vmatpush3.bf16.msra.mxu1 %v1254_v33 }
  0x6b   : > { %1125 = vmatprep.subr.bf16.mxu0 %v1255_v34  ;;  %1140 = vmatprep.subr.bf16.mxu1 %v1255_v34 }
  0x6e   : > { %1126 = vmatpush3.bf16.msra.mxu0 %v1255_v34  ;;  %1144 = vmatpush3.bf16.msra.mxu1 %v1255_v34 }
  0x6f   : > { %1127 = vmatprep.subr.bf16.mxu0 %v1256_v35  ;;  %1141 = vmatprep.subr.bf16.mxu1 %v1256_v35 }
  0x70   : > { %564 = vmatmul.mubr.bf16.gmra.mrb[4].mxu0 %v1247_v28  ;;  %732 = vmatmul.mubr.bf16.gmra.mrb[4].mxu1 %v1247_v28 }
  0x71   : > { %1080 = vmatprep.mubr.msk.bf16.mxu0 %vm510_vm0, %v1248_v29  ;;  %1097 = vmatprep.mubr.msk.bf16.mxu1 %vm510_vm0, %v1248_v29 }
  0x72   : > { %1128 = vmatpush3.bf16.msra.mxu0 %v1256_v35  ;;  %1145 = vmatpush3.bf16.msra.mxu1 %v1256_v35 }
  0x73   : > { %1129 = vmatprep.subr.bf16.mxu0 %v1257_v36  ;;  %1142 = vmatprep.subr.bf16.mxu1 %v1257_v36 }
  0x76   : > { %1130 = vmatpush3.bf16.msra.mxu0 %v1257_v36  ;;  %1146 = vmatpush3.bf16.msra.mxu1 %v1257_v36 }
  0x78   : > { %572 = vmatmul.mubr.bf16.gmra.mrb[8].mxu0 %v1250_v30  ;;  %740 = vmatmul.mubr.bf16.gmra.mrb[8].mxu1 %v1250_v30 }
  0x79   : > { %1081 = vmatprep.mubr.msk.bf16.mxu0 %vm510_vm0, %v1251_v31  ;;  %1098 = vmatprep.mubr.msk.bf16.mxu1 %vm510_vm0, %v1251_v31 }
  0x80   : > { %580 = vmatmul.mubr.bf16.gmra.mrb[12].mxu0 %v1253_v32  ;;  %748 = vmatmul.mubr.bf16.gmra.mrb[12].mxu1 %v1253_v32 }
 0x13b   : > { %v557_v39 = vpop.f32.mrb[0].mxu0  ;;  %v725_v41 = vpop.f32.mrb[0].mxu1 }
 0x13c   : > { %v558_v40 = vadd.f32 %v1669_v37, %v557_v39  ;;  %v559_v42 = vpop.f32.mrb[1].mxu0  ;;  %v726_v43 = vadd.f32 %v1674_v38, %v725_v41  ;;  %v727_v44 = vpop.f32.mrb[1].mxu1 }
 0x13d   : > { %v560_v45 = vpop.f32.mrb[2].mxu0  ;;  %v728_v46 = vpop.f32.mrb[2].mxu1 }
 0x13e   : > { %1258 = vtanh.f32 %v558_v40  ;;  %v562_v47 = vpop.f32.mrb[3].mxu0  ;;  %v561_v48 = vadd.f32 %v1669_v37, %v560_v45  ;;  %v729_v49 = vadd.f32 %v1674_v38, %v728_v46  ;;  %v730_v50 = vpop.f32.mrb[3].mxu1 }
 0x13f   : > { %1260 = vtanh.f32 %v726_v43 }
 0x140   : > { %1262 = vtanh.f32 %v729_v49 }
 0x141   : > { %1264 = vtanh.f32 %v561_v48 }
 0x143   : > { %v565_v51 = vpop.f32.mrb[4].mxu0  ;;  %v733_v53 = vpop.f32.mrb[4].mxu1 }
 0x144   : > { %v566_v52 = vadd.f32 %v1669_v37, %v565_v51  ;;  %v567_v54 = vpop.f32.mrb[5].mxu0  ;;  %v734_v55 = vadd.f32 %v1674_v38, %v733_v53  ;;  %v735_v56 = vpop.f32.mrb[5].mxu1 }
 0x145   : > { %v568_v57 = vpop.f32.mrb[6].mxu0  ;;  %v736_v58 = vpop.f32.mrb[6].mxu1 }
 0x146   : > { %1266 = vtanh.f32 %v566_v52  ;;  %v570_v59 = vpop.f32.mrb[7].mxu0  ;;  %v569_v60 = vadd.f32 %v1669_v37, %v568_v57  ;;  %v737_v61 = vadd.f32 %v1674_v38, %v736_v58  ;;  %v738_v62 = vpop.f32.mrb[7].mxu1 }
 0x147   : > { %1268 = vtanh.f32 %v734_v55  ;;  %v802_v59 = vld [vmem:[%s359_s30 + $0x10] sm:$0xff]  ;;  %v803_v62 = vld [vmem:[%s359_s30 + $0x18] sm:$0xff] }
 0x148   : > { %v1259_v63 = vpop.eup %1258  ;;  %1270 = vtanh.f32 %v737_v61 }
 0x149   : > { %v1261_v0 = vpop.eup %1260  ;;  %1272 = vtanh.f32 %v569_v60  ;;  %v800_v60 = vld [vmem:[%s359_s30] sm:$0xff] }
 0x14a   : > { %v772_v1 = vadd.f32 1.0, %v1261_v0  ;;  %v1263_v2 = vpop.eup %1262 }
 0x14b   : > { %v573_v3 = vpop.f32.mrb[8].mxu0  ;;  %v773_v5 = vadd.f32 1.0, %v1263_v2  ;;  %v741_v7 = vpop.f32.mrb[8].mxu1 }
 0x14c   : > { %v780_v4 = vmul.f32 %v1259_v63, %v772_v1  ;;  %v574_v6 = vadd.f32 %v1669_v37, %v573_v3  ;;  %v575_v8 = vpop.f32.mrb[9].mxu0  ;;  %v1265_v9 = vpop.eup %1264  ;;  %v742_v10 = vadd.f32 %v1674_v38, %v741_v7  ;;  %v801_v1 = vld [vmem:[%s359_s30 + $0x8] sm:$0xff]  ;;  %v806_v7 = vld [vmem:[%s359_s30 + $0x30] sm:$0xff] }
 0x14d   : > { %v743_v11 = vpop.f32.mrb[9].mxu1  ;;  %v576_v12 = vpop.f32.mrb[10].mxu0  ;;  %v781_v13 = vmul.f32 %v1265_v9, %v773_v5  ;;  %v804_v8 = vld [vmem:[%s359_s30 + $0x20] sm:$0xff] }
 0x14e   : > { %1274 = vtanh.f32 %v574_v6  ;;  %v744_v14 = vpop.f32.mrb[10].mxu1  ;;  %v578_v15 = vpop.f32.mrb[11].mxu0  ;;  %v577_v16 = vadd.f32 %v1669_v37, %v576_v12 }
 0x14f   : > { %1276 = vtanh.f32 %v742_v10  ;;  %v745_v17 = vadd.f32 %v1674_v38, %v744_v14  ;;  %v746_v18 = vpop.f32.mrb[11].mxu1  ;;  %v788_v20 = vpack.c.bf16 %v781_v13, %v780_v4  ;;  %v807_v10 = vld [vmem:[%s359_s30 + $0x38] sm:$0xff]  ;;  %v805_v13 = vld [vmem:[%s359_s30 + $0x28] sm:$0xff] }
 0x150   : > { %v1267_v19 = vpop.eup %1266 }
 0x151   : > { %v1269_v21 = vpop.eup %1268  ;;  %1278 = vtanh.f32 %v745_v17  ;;  %1131 = vmatprep.mubr.msk.bf16.mxu0 %vm510_vm0, %v788_v20 }
 0x152   : > { %v774_v22 = vadd.f32 1.0, %v1269_v21  ;;  %v1271_v23 = vpop.eup %1270  ;;  %1280 = vtanh.f32 %v577_v16 }
 0x153   : > { %v581_v24 = vpop.f32.mrb[12].mxu0  ;;  %v775_v26 = vadd.f32 1.0, %v1271_v23  ;;  %v749_v28 = vpop.f32.mrb[12].mxu1 }
 0x154   : > { %v782_v25 = vmul.f32 %v1267_v19, %v774_v22  ;;  %v582_v27 = vadd.f32 %v1669_v37, %v581_v24  ;;  %v583_v29 = vpop.f32.mrb[13].mxu0  ;;  %v1273_v30 = vpop.eup %1272  ;;  %v750_v31 = vadd.f32 %v1674_v38, %v749_v28 }
 0x155   : > { %v751_v32 = vpop.f32.mrb[13].mxu1  ;;  %v584_v33 = vpop.f32.mrb[14].mxu0  ;;  %v783_v34 = vmul.f32 %v1273_v30, %v775_v26 }
 0x156   : > { %1282 = vtanh.f32 %v582_v27  ;;  %v752_v35 = vpop.f32.mrb[14].mxu1  ;;  %v586_v36 = vpop.f32.mrb[15].mxu0  ;;  %v585_v39 = vadd.f32 %v1669_v37, %v584_v33 }
 0x157   : > { %1284 = vtanh.f32 %v750_v31  ;;  %v753_v40 = vadd.f32 %v1674_v38, %v752_v35  ;;  %v754_v41 = vpop.f32.mrb[15].mxu1  ;;  %v789_v43 = vpack.c.bf16 %v783_v34, %v782_v25 }
 0x158   : > { %v1275_v42 = vpop.eup %1274 }
 0x159   : > { %v1277_v44 = vpop.eup %1276  ;;  %1286 = vtanh.f32 %v753_v40  ;;  %1132 = vmatmul.mubr.msk.bf16.vlgmr.msra.gmra.mrb[16].mxu0 %vm510_vm0, %v789_v43 }
 0x15a   : > { %v776_v45 = vadd.f32 1.0, %v1277_v44  ;;  %1288 = vtanh.f32 %v585_v39 }
 0x15b   : > { %v1279_v46 = vpop.eup %1278 }
 0x15c   : > { %v784_v47 = vmul.f32 %v1275_v42, %v776_v45  ;;  %v777_v48 = vadd.f32 1.0, %v1279_v46  ;;  %v1281_v49 = vpop.eup %1280 }
 0x15e   : > { %v785_v50 = vmul.f32 %v1281_v49, %v777_v48 }
 0x160   : > { %v1283_v37 = vpop.eup %1282  ;;  %v790_v51 = vpack.c.bf16 %v785_v50, %v784_v47 }
 0x161   : > { %v1285_v38 = vpop.eup %1284 }
 0x162   : > { %v778_v52 = vadd.f32 1.0, %v1285_v38  ;;  %1135 = vmatprep.mubr.msk.bf16.mxu1 %vm510_vm0, %v790_v51 }
 0x163   : > { %v1287_v53 = vpop.eup %1286 }
 0x164   : > { %v786_v54 = vmul.f32 %v1283_v37, %v778_v52  ;;  %v779_v55 = vadd.f32 1.0, %v1287_v53  ;;  %v1289_v56 = vpop.eup %1288 }
 0x166   : > { %v787_v57 = vmul.f32 %v1289_v56, %v779_v55 }
 0x168   : > { %v791_v58 = vpack.c.bf16 %v787_v57, %v786_v54 }
 0x16a   : > { %1136 = vmatmul.mubr.msk.bf16.vlgmr.msra.gmra.mrb[16].mxu1 %vm510_vm0, %v791_v58 }
 0x22c   : > { %v1133_v61 = vpop.f32.mrb[16].mxu0 }
 0x22d   : > { %v887_v63 = vadd.f32 %v1133_v61, %v802_v59  ;;  %v878_v0 = vpop.f32.mrb[17].mxu0 }
 0x22e   : > { %v879_v2 = vadd.f32 %v878_v0, %v800_v60  ;;  %v1134_v3 = vpop.f32.mrb[18].mxu0 }
 0x22f   : > { %911 = vst [vmem:[%s339_s8 + $0x10] sm:$0xff] %v887_v63  ;;  %v890_v4 = vadd.f32 %v1134_v3, %v803_v62  ;;  %v881_v5 = vpop.f32.mrb[19].mxu0 }
 0x230   : > { %909 = vst [vmem:[%s339_s8] sm:$0xff] %v879_v2  ;;  %v882_v6 = vadd.f32 %v881_v5, %v801_v1 }
 0x231   : > { %912 = vst [vmem:[%s339_s8 + $0x18] sm:$0xff] %v890_v4 }
 0x232   : > { %910 = vst [vmem:[%s339_s8 + $0x8] sm:$0xff] %v882_v6 }
 0x23d   : > { %v1137_v9 = vpop.f32.mrb[16].mxu1 }
 0x23e   : > { %v903_v11 = vadd.f32 %v1137_v9, %v806_v7  ;;  %v894_v12 = vpop.f32.mrb[17].mxu1 }
 0x23f   : > { %v895_v14 = vadd.f32 %v894_v12, %v804_v8  ;;  %v1138_v15 = vpop.f32.mrb[18].mxu1 }
 0x240   : > { %915 = vst [vmem:[%s339_s8 + $0x30] sm:$0xff] %v903_v11  ;;  %v906_v16 = vadd.f32 %v1138_v15, %v807_v10  ;;  %v897_v17 = vpop.f32.mrb[19].mxu1 }
 0x241   : > { %913 = vst [vmem:[%s339_s8 + $0x20] sm:$0xff] %v895_v14  ;;  %v898_v18 = vadd.f32 %v897_v17, %v805_v13 }
 0x242   : > { %916 = vst [vmem:[%s339_s8 + $0x38] sm:$0xff] %v906_v16 }
 0x243   : > { %914 = vst [vmem:[%s339_s8 + $0x28] sm:$0xff] %v898_v18 }
 0x244   : > { %1331 = shalt.err (!%p1328_p6)
}
 0x245   : > { %s1332_s21 = scalar_lea.hbm %s1710_s12, 1024  ;;  %s1336_s8 = scalar_lea.hbm %s1767_s7, 2048 }
 0x246   : > { %p1333_p7 = scmp.ne.s32.totalorder %s1710_s12, %s1332_s21  ;;  %p1337_p0 = scmp.lt.u32.totalorder %s1710_s12, %s1767_s7 }
 0x247   : > { %p1338_p2 = scmp.lt.u32.totalorder %s1336_s8, %s1332_s21  ;;  %p1340_p8 = scmp.lt.u32.totalorder %s1332_s21, %s1710_s12 }
 0x248   : > { %p1334_p9 = pnand %p1333_p7, %p1779_p10 }
 0x249   : > { %p1339_p4 = por %p1338_p2, %p1337_p0 }
 0x24a   : > { %p1335_p12 = pneg %p1334_p9 }
 0x24b   : > { %p1341_p11 = por %p1340_p8, %p1339_p4 }
 0x24d   : > { %p1342_p13 = pnand %p1341_p11, %p1335_p12 }
 0x24f   : > { %1345 = shalt.err (!%p1342_p13)
}
 0x250   : > { %s1407_s15 = smov 128   ;;  %s1408_s17 = smov 8  }
 0x251   : > { %1151 = dma.vmem_to_hbm [thread:$0]  (%p1779_p10), %s1705_s10, 1024, %s1710_s12, %s1714_s27, %s1407_s15, %s1407_s15, %s1408_s17  }
 0x252 PF: > { %p1163_p1 = scmp.ge.s32.totalorder %s1400_s29, 2  ;;  %s948_s20 = sand.u32 1, %s1380_s24  }
 0x253   : > { %p1780_p3 = scmp.ne.s32.totalorder %s1773_s13, 0  ;;  %s949_s22 = scalar_lea.sflag [#allocation4], %s948_s20 }
 0x255   : > { %p1158_p5 = pnand %p1163_p1, %p1780_p3 }
 0x257   : > { %1375 = dma.done.wait (!%p1158_p5), %s949_s22, 1024  }
 0x258   : > { %1377 = vsyncadd (!%p1158_p5), %s949_s22, 4294966272  ;;  %s21_s29 = sadd.s32 1, %s1400_s29   ;;  %s1781_s24 = smov %s1384_s25 }
 0x259   : > { %p18_p6 = scmp.ge.s32.totalorder %s21_s29, 4   ;;  %s1782_s25 = smov %s1388_s26 }
 0x25a   : > { %s1783_s26 = smov %s1502_s14  ;;  %s1784_s27 = smov %s1396_s28 }
 0x25b   : > { %s1785_s28 = smov %s1787_s9  ;;  %20 = sbr.rel (!%p18_p6) target bundleno = 5 (0x5), region = 91 }
 0x262   :  { %954 = vsyncpa [#allocation3], 1 }
 0x263   :  { %956 = vsyncpa [#allocation3 + $0x1], 1 }
 0x264   :  { %957 = vsyncpa [#allocation4], 1 }
 0x265   :  { %959 = vsyncpa [#allocation4 + $0x1], 1 }

</bundles_post_ra>
